<compile_context>
chip_gen: v5e
topology: v5e:2x2
jax: 0.10.0
libtpu: 0.0.40
codegen_flags: <defaults>
</compile_context>

<pallas_src>
import math
import functools

import jax
import jax.numpy as jnp
from jax import lax
from jax.experimental import pallas as pl
from jax.experimental.pallas import tpu as pltpu


# ----------------------------- buffer setup ---------------------------------


def make_sinusoidal_pe(d_model: int, max_len: int = 5000) -> jnp.ndarray:
    """Build the (1, max_len, d_model) positional-encoding buffer (fp32)."""
    position = jnp.arange(0, max_len, dtype=jnp.float32)[:, None]            # (L, 1)
    div_term = jnp.exp(
        jnp.arange(0, d_model, 2, dtype=jnp.float32)
        * (-math.log(10000.0) / d_model)
    )                                                                         # (D/2,)
    ang = position * div_term                                                 # (L, D/2)
    pe = jnp.zeros((max_len, d_model), dtype=jnp.float32)
    pe = pe.at[:, 0::2].set(jnp.sin(ang))
    pe = pe.at[:, 1::2].set(jnp.cos(ang))
    return pe[None, :, :]                                                     # (1, L, D)


# ----------------------------- kernels ---------------------------------------


def _pe_add_kernel(x_ref, pe_ref, o_ref):
    # eval-mode forward: x + pe[:, :S, :]  (dropout is identity).
    # Cast the pe tile to the input dtype so the add stays in the input dtype
    # (matters for bf16 on v5e); free when dtypes already match.
    o_ref[...] = x_ref[...] + pe_ref[...].astype(x_ref.dtype)


def _pe_add_dropout_hw_kernel(seed_ref, x_ref, pe_ref, o_ref, *,
                              p: float, tile_rows: int, cols: int):
    # training-mode forward on TPU: inverted dropout(x + pe) using the HW PRNG.
    # Per-tile seed = (user seed, row-tile id, batch id) -> independent masks per tile,
    # no cross-tile RNG state, deterministic given the seed.
    pltpu.prng_seed(seed_ref[0], pl.program_id(0), pl.program_id(1))
    y = x_ref[...] + pe_ref[...].astype(x_ref.dtype)

    gen_rows = ((tile_rows + 7) // 8) * 8          # sublane-aligned generation shape
    bits = pltpu.prng_random_bits((1, gen_rows, cols))
    if bits.dtype != jnp.int32:
        bits = pltpu.bitcast(bits, jnp.int32)
    if gen_rows != tile_rows:
        bits = bits[:, :tile_rows, :]

    r31 = bits & 0x7FFFFFFF                        # uniform in [0, 2^31)
    thresh = min(int(round(p * 2147483648.0)), 2147483647)
    keep = r31 >= thresh                           # keep with prob (1 - p)
    scale = 1.0 / (1.0 - p)                        # python float -> weak type, no f32 widening
    o_ref[...] = jnp.where(keep, y * scale, jnp.zeros_like(y))


def _pe_add_dropout_hash_kernel(seed_ref, x_ref, pe_ref, o_ref, *,
                                p: float, rows_total: int, tile_rows: int, cols: int):
    # Fallback for non-TPU backends (interpret mode): stateless counter hash.
    r = pl.program_id(0)
    b = pl.program_id(1)
    y = x_ref[...] + pe_ref[...].astype(x_ref.dtype)

    shape = (1, tile_rows, cols)
    row_iota = lax.broadcasted_iota(jnp.int32, shape, 1)
    col_iota = lax.broadcasted_iota(jnp.int32, shape, 2)
    base = (b * rows_total + r * tile_rows) * cols                 # scalar, folded once
    lin = base + row_iota * cols + col_iota                        # unique counter

    h = lin ^ seed_ref[0]
    h = h * (-1640531535)                     # 0x9E3779B1
    h = h ^ ((h >> 16) & 0xFFFF)
    h = h * (-2048144789)                     # 0x85EBCA6B
    h = h ^ ((h >> 13) & 0x7FFFF)
    h = h * (-1028477387)                     # 0xC2B2AE35
    h = h ^ ((h >> 16) & 0xFFFF)
    r31 = h & 0x7FFFFFFF

    thresh = min(int(round(p * 2147483648.0)), 2147483647)
    keep = r31 >= thresh
    scale = 1.0 / (1.0 - p)
    o_ref[...] = jnp.where(keep, y * scale, jnp.zeros_like(y))


# ----------------------------- wrapper helpers --------------------------------

_MAX_TILE_BYTES = 8 * 1024 * 1024           # per-x-tile budget cap (review: <2% gain past 4 MiB)
_SMALL_FULL_EXTENT_BYTES = 4 * 1024 * 1024  # unaligned rows: below this, one full-extent block
_VMEM_WS_CAP = 48 * 1024 * 1024             # cap on double-buffered working set (v7x: 64 MiB phys)


def _sublane_multiple(itemsize: int) -> int:
    # fp32 -> 8, bf16/fp16 -> 16, int8/fp8 -> 32 (sub-32-bit dtypes pack along sublanes)
    return 8 * max(1, 4 // max(itemsize, 1))


def _pick_row_tile(rows: int, cols: int, x_itemsize: int, pe_itemsize: int,
                   sub: int, max_tile_bytes: int) -> int:
    """Largest sublane-aligned row tile dividing `rows` within tile & VMEM budgets."""
    per_row_x = max(cols * x_itemsize, 1)
    per_row_all = max(cols * (2 * x_itemsize + pe_itemsize), 1)   # x + out + pe per row
    max_rows = min(max_tile_bytes // per_row_x,
                   _VMEM_WS_CAP // (2 * per_row_all))
    tr = max(sub, (max_rows // sub) * sub)
    tr = min(tr, rows)
    while rows % tr:
        tr -= sub
    return max(tr, sub)


# ----------------------------- wrapper ---------------------------------------


def positional_encoding(
    x: jnp.ndarray,
    pe: jnp.ndarray,
    *,
    dropout_p: float = 0.2,
    training: bool = False,
    seed: int = 0,
    max_tile_bytes: int = 4 * 1024 * 1024,
) -> jnp.ndarray:
    """Forward pass of PositionalEncoding.   x: (B, S, D),  pe: (1, max_len, D)."""
    B, S, D = x.shape
    L = pe.shape[1]
    assert pe.shape[0] == 1 and pe.shape[2] == D and S <= L

    dtype = x.dtype
    itemsize = jnp.dtype(dtype).itemsize
    pe_itemsize = jnp.dtype(pe.dtype).itemsize
    sub = _sublane_multiple(itemsize)
    max_tile_bytes = int(min(max(max_tile_bytes, 4096), _MAX_TILE_BYTES))

    # ---- 1. lane-dense column canonicalization of x (layout plumbing only) ----
    if D % 128 == 0:
        mode, C, R = "keep", D, S
        x2 = x
    elif (S * D) % 128 == 0:
        mode, C, R = "flatten", 128, (S * D) // 128
        x2 = x.reshape(B, R, C)                      # contiguous reshape -> free
    else:
        # TODO(synk): pad-to-128 path costs one extra pad pass over x; unavoidable without
        # masked partial stores, which measured far worse for bandwidth-bound kernels.
        mode = "pad_cols"
        C = ((D + 127) // 128) * 128
        R = S
        x2 = jnp.pad(x, ((0, 0), (0, 0), (0, C - D)))

    # ---- 2. row (sublane) alignment ----
    aligned = (R % sub == 0)
    row_pad = 0
    if not aligned:
        if R * C * itemsize <= min(max_tile_bytes, _SMALL_FULL_EXTENT_BYTES):
            pass                                     # tiny: single full-extent row block
        else:
            row_pad = (-R) % sub                     # large unaligned: pad rows, slice after
            x2 = jnp.pad(x2, ((0, 0), (0, row_pad), (0, 0)))
    R2 = R + row_pad

    # ---- 3. pe operand: avoid materializing pe[:, :S, :] whenever possible ----
    if mode == "keep" and aligned and L >= R2:
        pe2 = pe                                     # raw buffer; index_map picks rows
    elif mode == "flatten" and aligned and (L * D) % 128 == 0 and (L * D) // 128 >= R2:
        pe2 = pe.reshape(1, (L * D) // 128, 128)     # contiguous reshape -> free
    else:
        pe2 = pe[:, :S, :]                           # fallback paths only
        if mode == "pad_cols":
            pe2 = jnp.pad(pe2, ((0, 0), (0, 0), (0, C - D)))
        pe2 = pe2.reshape(1, R, C)
        if row_pad:
            pe2 = jnp.pad(pe2, ((0, 0), (0, row_pad), (0, 0)))

    # ---- 4. tile / grid ----
    if aligned or row_pad:
        TR = _pick_row_tile(R2, C, itemsize, pe_itemsize, sub, max_tile_bytes)
    else:
        TR = R2                                      # tiny full-extent block
    grid = (R2 // TR, B)                             # B innermost -> pe block fetched once per row tile

    def x_map(r, b, *_):                             # *_ absorbs optional scalar-prefetch ref
        return (b, r, 0)

    def pe_map(r, b, *_):
        return (0, r, 0)

    x_spec = pl.BlockSpec((1, TR, C), x_map)
    pe_spec = pl.BlockSpec((1, TR, C), pe_map)
    out_spec = pl.BlockSpec((1, TR, C), x_map)
    out_shape = jax.ShapeDtypeStruct((B, R2, C), dtype)

    # VMEM limit derived from the actual tile: x + out double-buffered, pe double-buffered,
    # plus slack for Mosaic internal scratch / PRNG temporaries.
    x_tile = TR * C * itemsize
    pe_tile = TR * C * pe_itemsize
    vmem_limit = int(min(max(2 * (2 * x_tile + pe_tile) + (4 << 20), 16 << 20), 56 << 20))
    cparams = pltpu.CompilerParams(
        dimension_semantics=("parallel", "parallel"),
        vmem_limit_bytes=vmem_limit,
    )

    bytes_accessed = itemsize * 2 * B * R2 * C + pe_itemsize * R2 * C
    cost_eval = pl.CostEstimate(flops=B * R2 * C, transcendentals=0,
                                bytes_accessed=bytes_accessed)
    cost_train = pl.CostEstimate(flops=5 * B * R2 * C, transcendentals=0,
                                 bytes_accessed=bytes_accessed)

    def restore(out2):
        if row_pad:
            out2 = out2[:, :R, :]
        if mode == "keep":
            return out2
        if mode == "flatten":
            return out2.reshape(B, S, D)
        return out2[:, :, :D]                        # pad_cols

    train = bool(training) and dropout_p > 0.0
    if not train:
        out2 = pl.pallas_call(
            _pe_add_kernel,
            out_shape=out_shape,
            grid_spec=pltpu.PrefetchScalarGridSpec(
                num_scalar_prefetch=0, grid=grid,
                in_specs=[x_spec, pe_spec], out_specs=out_spec),
            compiler_params=cparams,
            cost_estimate=cost_eval,
        )(x2, pe2)
        return restore(out2)

    if dropout_p >= 1.0:
        return jnp.zeros_like(x)

    # TODO(synk): PyTorch's dropout RNG stream cannot be reproduced bit-exactly; this uses
    # the TPU hardware PRNG (per-tile seeded) with identical keep-prob and 1/(1-p) scaling.
    seed_arr = jnp.array([seed], dtype=jnp.int32)
    if jax.default_backend() == "tpu":
        kernel = functools.partial(_pe_add_dropout_hw_kernel,
                                   p=float(dropout_p), tile_rows=TR, cols=C)
    else:
        kernel = functools.partial(_pe_add_dropout_hash_kernel,
                                   p=float(dropout_p), rows_total=R2,
                                   tile_rows=TR, cols=C)
    out2 = pl.pallas_call(
        kernel,
        out_shape=out_shape,
        grid_spec=pltpu.PrefetchScalarGridSpec(
            num_scalar_prefetch=1, grid=grid,
            in_specs=[x_spec, pe_spec], out_specs=out_spec),
        compiler_params=cparams,
        cost_estimate=cost_train,
    )(seed_arr, x2, pe2)
    return restore(out2)


# ----------------------------- main ------------------------------------------

if __name__ == "__main__":
    MAX_LEN = 5000
    p = 0.2

    # --- primary small shape (matches the module's toy usage) ---
    B, S, D = 2, 8, 32
    key = jax.random.PRNGKey(0)
    x = jax.random.normal(key, (B, S, D), dtype=jnp.float32)
    pe = make_sinusoidal_pe(D, MAX_LEN)

    # eval-mode forward (dropout = identity) -- deterministic reference check
    out = positional_encoding(x, pe, dropout_p=p, training=False)
    out = jax.block_until_ready(out)
    ref = x + pe[:, :S, :]
    assert out.shape == (B, S, D)
    assert jnp.allclose(out, ref, atol=1e-6), "eval-mode mismatch vs reference"

    # training-mode forward: every output element must be 0 or (x+pe)/(1-p)
    out_tr = positional_encoding(x, pe, dropout_p=p, training=True, seed=123)
    out_tr = jax.block_until_ready(out_tr)
    scaled = ref / (1.0 - p)
    ok = (jnp.abs(out_tr) < 1e-6) | (jnp.abs(out_tr - scaled) < 1e-4)
    assert bool(jnp.all(ok)), "dropout output must be 0 or scaled (x + pe)"
    keep_frac = float(jnp.mean((jnp.abs(out_tr) > 1e-6).astype(jnp.float32)))
    assert 0.5 < keep_frac < 0.97, f"implausible keep fraction {keep_frac}"

    # --- secondary aligned shape exercising the multi-row-tile grid + raw-pe path ---
    B2, S2, D2 = 2, 512, 128
    x_big = jax.random.normal(jax.random.PRNGKey(1), (B2, S2, D2), dtype=jnp.float32)
    pe_big = make_sinusoidal_pe(D2, MAX_LEN)

    out_big = positional_encoding(x_big, pe_big, dropout_p=p, training=False,
                                  max_tile_bytes=64 * 1024)   # force TR=128 -> grid (4, 2)
    out_big = jax.block_until_ready(out_big)
    ref_big = x_big + pe_big[:, :S2, :]
    assert jnp.allclose(out_big, ref_big, atol=1e-5), "tiled eval mismatch"

    out_big_tr = positional_encoding(x_big, pe_big, dropout_p=p, training=True, seed=7,
                                     max_tile_bytes=64 * 1024)
    out_big_tr = jax.block_until_ready(out_big_tr)
    scaled_big = ref_big / (1.0 - p)
    ok_big = (jnp.abs(out_big_tr) < 1e-6) | (jnp.abs(out_big_tr - scaled_big) < 1e-4)
    assert bool(jnp.all(ok_big)), "tiled dropout output must be 0 or scaled (x + pe)"
    keep_big = float(jnp.mean((jnp.abs(out_big_tr) > 1e-6).astype(jnp.float32)))
    assert abs(keep_big - (1.0 - p)) < 0.03, f"keep fraction {keep_big} far from {1 - p}"
    m0 = jnp.abs(out_big_tr[0]) > 1e-6
    m1 = jnp.abs(out_big_tr[1]) > 1e-6
    assert bool(jnp.any(m0 != m1)), "dropout masks correlated across batch"

    print("KERNEL_OK")
</pallas_src>

<mosaic_0001>
module attributes {stable_mosaic.version = 11 : i64} {
  func.func @_pe_add_kernel(%arg0: i32, %arg1: i32, %arg2: memref<1x2x128xf32, #tpu.memory_space<vmem>>, %arg3: memref<1x2x128xf32, #tpu.memory_space<vmem>>, %arg4: memref<1x2x128xf32, #tpu.memory_space<vmem>>) attributes {dimension_semantics = [#tpu.dimension_semantics<parallel>, #tpu.dimension_semantics<parallel>], iteration_bounds = array<i64: 1, 2>, scalar_prefetch = 0 : i64, scratch_operands = 0 : i64, tpu.core_type = #tpu.core_type<tc>, window_params = [{transform_indices = @transform_0, window_bounds = array<i64: 1, 2, 128>}, {transform_indices = @transform_1, window_bounds = array<i64: 1, 2, 128>}, {transform_indices = @transform_2, window_bounds = array<i64: 1, 2, 128>}]} {
    %c0 = arith.constant 0 : index
    %c0_0 = arith.constant 0 : index
    %c0_1 = arith.constant 0 : index
    %0 = vector.load %arg2[%c0, %c0_0, %c0_1] : memref<1x2x128xf32, #tpu.memory_space<vmem>>, vector<1x2x128xf32>
    %c0_2 = arith.constant 0 : index
    %c0_3 = arith.constant 0 : index
    %c0_4 = arith.constant 0 : index
    %1 = vector.load %arg3[%c0_2, %c0_3, %c0_4] : memref<1x2x128xf32, #tpu.memory_space<vmem>>, vector<1x2x128xf32>
    %2 = arith.addf %0, %1 : vector<1x2x128xf32>
    %c0_5 = arith.constant 0 : index
    %c0_6 = arith.constant 0 : index
    %c0_7 = arith.constant 0 : index
    %3 = vector.load %arg4[%c0_5, %c0_6, %c0_7] : memref<1x2x128xf32, #tpu.memory_space<vmem>>, vector<1x2x128xf32>
    tpu.vector_store %arg4[%c0_5, %c0_6, %c0_7], %2 {strides = array<i32>} : memref<1x2x128xf32, #tpu.memory_space<vmem>>, vector<1x2x128xf32>,
    return
  }
  func.func @transform_0(%arg0: i32, %arg1: i32) -> (i32, i32, i32) {
    %c0_i32 = arith.constant 0 : i32
    %c0_i32_0 = arith.constant 0 : i32
    return %arg1, %arg0, %c0_i32 : i32, i32, i32
  }
  func.func @transform_1(%arg0: i32, %arg1: i32) -> (i32, i32, i32) {
    %c0_i32 = arith.constant 0 : i32
    %c0_i32_0 = arith.constant 0 : i32
    %c0_i32_1 = arith.constant 0 : i32
    return %c0_i32, %arg0, %c0_i32_0 : i32, i32, i32
  }
  func.func @transform_2(%arg0: i32, %arg1: i32) -> (i32, i32, i32) {
    %c0_i32 = arith.constant 0 : i32
    %c0_i32_0 = arith.constant 0 : i32
    return %arg1, %arg0, %c0_i32 : i32, i32, i32
  }
}

</mosaic_0001>

<bundles_post_ra>
// kernel: tpu_custom_call.1
= control target key start
LH: loop header
LB: loop body
LE: loop exit
PB: predicated region body
PF: predicated region fallthrough
CT: control target
= control target key end

     0   :  { %7 = vsyncpa [#allocation3], 0  ;;  %s714_s0 = inlined_call_operand.hbm [shape: f32[2,2,128], index: 0, kind: input, shape index: {}]   ;;  %s715_s1 = inlined_call_operand.hbm [shape: f32[1,2,128], index: 1, kind: input, shape index: {}]   ;;  %s716_s2 = inlined_call_operand.hbm [shape: f32[2,2,128], index: 2, kind: output, shape index: {}]  }
   0x1   :  { %9 = vsyncpa [#allocation3 + $0x1], 0 }
   0x2   :  { %10 = vsyncpa [#allocation6], 0 }
   0x3   :  { %11 = vsyncpa [#allocation4], 0 }
   0x4   :  { %13 = vsyncpa [#allocation4 + $0x1], 0  ;;  %s565_s9 = smov 0   ;;  %s567_s10 = smov 0  }
   0x5   :  { %s569_s11 = smov 0   ;;  %s571_s12 = smov 0  }
   0x6   :  { %s573_s13 = smov 0   ;;  %s575_s14 = smov 0  }
   0x7 LB: > { %s313_s15 = sadd.s32 4294967295, %s547_s14   ;;  %s314_s16 = sadd.s32 4294967294, %s547_s14   ;;  %s547_s14 = sphi %s575_s14, %s19_s14   ;;  %s543_s13 = sphi %s573_s13, %s728_s13   ;;  %s539_s12 = sphi %s571_s12, %s727_s12   ;;  %s535_s11 = sphi %s569_s11, %s726_s11   ;;  %s531_s10 = sphi %s567_s10, %s725_s10   ;;  %s527_s9 = sphi %s565_s9, %s724_s9  }
   0x8   : > { %p53_p0 = scmp.ne.s32.totalorder %s531_s10, %s527_s9  ;;  %p599_p1 = scmp.eq.s32.totalorder %s313_s15, 0 }
   0x9   : > { %p603_p2 = scmp.eq.s32.totalorder %s313_s15, 1  ;;  %p111_p3 = scmp.eq.s32.totalorder %s314_s16, 1 }
   0xa   : > { %p609_p4 = por %p599_p1, %p53_p0  ;;  %p315_p5 = scmp.ge.s32.totalorder %s547_s14, 1 }
   0xb   : > { %p614_p6 = por %p111_p3, %p53_p0  ;;  %p118_p7 = scmp.lt.s32.totalorder %s547_s14, 3 }
   0xc   : > { %s132_s23 = sshll.u32 %s715_s1, 4  ;;  %p317_p9 = scmp.ge.s32.totalorder %s547_s14, 2  ;;  %s133_s23 = int_to_ptr.hbm [resolvable:$true] %s132_s23 }
   0xd   : > { %p622_p8 = pnand %p315_p5, %p118_p7  ;;  %s549_s25 = smov [#allocation5]  }
   0xe   : > { %s134_s26 = sshll.u32 %s549_s25, 4  ;;  %s28_s27 = sadd.s32 1, %s543_s13  ;;  %s135_s26 = int_to_ptr.vmem [resolvable:$true] %s134_s26 }
   0xf   : > { %p336_p10 = pneg %p622_p8  ;;  %p29_p12 = scmp.ge.s32.totalorder %s28_s27, 2 }
  0x10   : > { %s40_s28 = sadd.s32 1, %s535_s11  ;;  %p47_p13 = scmp.ne.s32.totalorder %s535_s11, %s531_s10 }
  0x11   : > { %p337_p11 = pnand %p336_p10, %p599_p1  ;;  %p48_p0 = scmp.eq.s32.totalorder %s547_s14, 0 }
  0x12   : > { %s730_s27 = smov (%p29_p12, %s28_s27), 0  ;;  %p644_p5 = por %p603_p2, %p47_p13 }
  0x13   : > { %339 = dma.hbm_to_vmem [thread:$0]  (!%p337_p11), %s133_s23, 32, %s135_s26, [#allocation6]  }
  0x14   : > { %p638_p3 = por %p48_p0, %p47_p13  ;;  %s35_s3 = ssub.s32 %s543_s13, %s730_s27 }
  0x15   : > { %p349_p7 = scmp.lt.s32.totalorder %s547_s14, 2  ;;  %p38_p10 = scmp.eq.s32.totalorder %s35_s3, 0 }
  0x16   : > { %s145_s4 = sand.u32 1, %s535_s11   ;;  %s319_s7 = sshll.u32 %s543_s13, 1 }
  0x17   : > { %s318_s5 = sshll.u32 %s145_s4, 1  ;;  %s154_s16 = scalar_lea.hbm %s714_s0, %s319_s7 }
  0x18   : > { %s653_s6 = scalar_select %p38_p10, %s535_s11, %s40_s28  }
  0x19   : > { %s149_s21 = scalar_lea.vmem [#allocation2], %s318_s5  ;;  %s156_s18 = sshll.u32 %s154_s16, 4  ;;  %s157_s18 = int_to_ptr.hbm [resolvable:$true] %s156_s18 }
  0x1a   : > { %s158_s22 = sshll.u32 %s149_s21, 4  ;;  %p341_p2 = pnand %p349_p7, %p638_p3  ;;  %s159_s22 = int_to_ptr.vmem [resolvable:$true] %s158_s22 }
  0x1b   : > { %s146_s23 = scalar_lea.sflag [#allocation3], %s145_s4  ;;  %167 = sbr.rel (%p622_p8) target bundleno = 50 (0x32), region = 28 }
  0x1c   : > { %343 = dma.hbm_to_vmem [thread:$0]  (!%p341_p2), %s157_s18, 32, %s159_s22, %s146_s23  }
  0x1d   : > { %s664_s25 = sand.u32 (!%p622_p8), 1, %s531_s10  }
  0x1e   : > { %s321_s26 = sshll.u32 (!%p622_p8), %s664_s25, 1  ;;  %s170_s28 = scalar_lea.sflag (!%p622_p8), [#allocation3], %s664_s25 }
  0x1f   : > { %s173_s3 = scalar_lea.vmem (!%p622_p8), [#allocation2], %s321_s26 }
  0x20   : > { %514 = dma.done.wait (%p609_p4), %s170_s28, 32  }
  0x21   : > { %516 = vsyncadd (%p609_p4), %s170_s28, 4294967264 }
  0x22   : > { %518 = dma.done.wait (%p599_p1), [#allocation6], 32  }
  0x23   : > { %520 = vsyncadd (%p599_p1), [#allocation6], 4294967264  ;;  %s325_s24 = sshll.u32 %s539_s12, 1  ;;  %s199_s7 = scalar_lea.vmem [#allocation7], %s321_s26  ;;  %v200_v0 = vld [vmem:[%s173_s3] sm:$0x3] }
  0x24   : > { %s216_s5 = scalar_lea.hbm %s716_s2, %s325_s24  ;;  %s218_s8 = sshll.u32 %s199_s7, 4  ;;  %v201_v1 = vld [vmem:[#allocation5] sm:$0x3]  ;;  %s219_s8 = int_to_ptr.vmem [resolvable:$true] %s218_s8 }
  0x25   : > { %s220_s15 = sshll.u32 %s216_s5, 4  ;;  %v202_v2 = vadd.f32 %v201_v1, %v200_v0  ;;  %s205_s19 = scalar_lea.sflag [#allocation4], %s664_s25  ;;  %s221_s15 = int_to_ptr.hbm [resolvable:$true] %s220_s15 }
  0x26   : > { %s475_s17 = sshra.s32 %s221_s15, 4  ;;  %s481_s22 = scalar_lea.hbm %s716_s2, 4  ;;  %s476_s17 = int_to_ptr.hbm [resolvable:$true] %s475_s17 }
  0x27   : > { %203 = vst [vmem:[%s199_s7] sm:$0x3] %v202_v2  ;;  %s477_s16 = scalar_lea.hbm %s476_s17, 2  ;;  %p482_p11 = scmp.lt.s32.totalorder %s476_s17, %s716_s2 }
  0x28   : > { %p478_p1 = scmp.ne.s32.totalorder %s476_s17, %s477_s16  ;;  %p483_p12 = scmp.lt.s32.totalorder %s481_s22, %s477_s16 }
  0x2a   : > { %p479_p4 = pnand %p478_p1, %p644_p5  ;;  %p484_p13 = por %p483_p12, %p482_p11 }
  0x2c   : > { %p480_p8 = pneg %p479_p4 }
  0x2e   : > { %p485_p0 = pnand %p484_p13, %p480_p8 }
  0x30   : > { %488 = shalt.err (!%p485_p0)
}
  0x31   : > { %334 = dma.vmem_to_hbm [thread:$0]  (%p644_p5), %s219_s8, 32, %s221_s15, %s205_s19  }
  0x32 PF: > { %s232_s25 = sand.u32 1, %s527_s9   ;;  %p345_p3 = pnand %p317_p9, %p614_p6 }
  0x33   : > { %s233_s26 = scalar_lea.sflag [#allocation4], %s232_s25 }
  0x34   : > { %p346_p7 = pneg %p345_p3 }
  0x36   : > { %522 = dma.done.wait (%p346_p7), %s233_s26, 32  }
  0x37   : > { %524 = vsyncadd (%p346_p7), %s233_s26, 4294967264  ;;  %s19_s14 = sadd.s32 1, %s547_s14   ;;  %s724_s9 = smov %s531_s10 }
  0x38   : > { %p16_p10 = scmp.ge.s32.totalorder %s19_s14, 4   ;;  %s725_s10 = smov %s535_s11 }
  0x39   : > { %s726_s11 = smov %s653_s6  ;;  %s727_s12 = smov %s543_s13 }
  0x3a   : > { %s728_s13 = smov %s730_s27  ;;  %18 = sbr.rel (!%p16_p10) target bundleno = 7 (0x7), region = 78 }
  0x3f   :  { %239 = vsyncpa [#allocation3], 1 }
  0x40   :  { %241 = vsyncpa [#allocation3 + $0x1], 1 }
  0x41   :  { %242 = vsyncpa [#allocation6], 1 }
  0x42   :  { %243 = vsyncpa [#allocation4], 1 }
  0x43   :  { %245 = vsyncpa [#allocation4 + $0x1], 1 }

</bundles_post_ra>
